<compile_context>
chip_gen: v5e
topology: v5e:2x2
jax: 0.10.0
libtpu: 0.0.40
codegen_flags: <defaults>
</compile_context>

<pallas_src>
import functools

import jax
import jax.numpy as jnp
from jax.experimental import pallas as pl
from jax.experimental.pallas import tpu as pltpu

_LANE = 128


def _tpu_generation():
    """Best-effort TPU generation from device_kind; conservative on failure."""
    try:
        kind = jax.devices()[0].device_kind.lower()
        for g in (7, 6, 5, 4, 3, 2):
            if f"v{g}" in kind:
                return g
    except Exception:
        pass
    return 0


def _gen_block_params(gen):
    """(block_bytes, vmem_limit_bytes) per TPU generation."""
    if gen >= 7:
        return 8 << 20, 48 << 20   # 64 MiB physical VMEM per TC: leave headroom
    if gen == 6:
        return 8 << 20, 64 << 20
    if gen == 5:
        return 4 << 20, 32 << 20
    return 2 << 20, None           # unknown / old: stay under default limits


def _make_scale_kernel(native_compute):
    def kernel(scale_ref, x_ref, o_ref):
        # scale_ref: (1,) f32 scalar-prefetch ref in SMEM
        # x_ref / o_ref: (tile_rows, 128) tiles in VMEM, native dtype
        s = scale_ref[0]
        if native_compute:
            o_ref[...] = x_ref[...] * s.astype(o_ref.dtype)
        else:
            o_ref[...] = (x_ref[...].astype(jnp.float32) * s).astype(o_ref.dtype)
    return kernel


def _scale_slab(slab, scale_arr, *, tile_rows, native_compute, vmem_limit):
    rows = slab.shape[0]
    grid = (pl.cdiv(rows, tile_rows),)
    return pl.pallas_call(
        _make_scale_kernel(native_compute),
        out_shape=jax.ShapeDtypeStruct(slab.shape, slab.dtype),
        grid_spec=pltpu.PrefetchScalarGridSpec(
            num_scalar_prefetch=1,            # scale lands in SMEM before grid
            grid=grid,
            in_specs=[
                pl.BlockSpec((tile_rows, _LANE), lambda i, s: (i, 0)),
            ],
            out_specs=pl.BlockSpec((tile_rows, _LANE), lambda i, s: (i, 0)),
        ),
        compiler_params=pltpu.CompilerParams(
            dimension_semantics=("parallel",),
            vmem_limit_bytes=vmem_limit,
        ),
    )(scale_arr, slab)


def scale_forward(x, scale, *, min_kernel_bytes=1 << 18):
    """Elementwise x * scale (learnable scalar).

    Matches the PyTorch `Scale` module's forward. Tensors below
    `min_kernel_bytes` take a fused jnp fast path (kernel launch overhead
    would dominate); larger tensors stream through the Pallas kernel.
    """
    orig_shape = x.shape

    # Dtype policy: float inputs keep their dtype; ints promote to f32.
    if jnp.issubdtype(x.dtype, jnp.floating):
        out_dtype = x.dtype
    else:
        out_dtype = jnp.float32
    x = x.astype(out_dtype)
    itemsize = jnp.dtype(out_dtype).itemsize

    scale_arr = jnp.asarray(scale, jnp.float32).reshape(1)
    n = x.size

    # Small-tensor fast path: a fused scalar multiply beats any kernel launch.
    if n * itemsize < min_kernel_bytes:
        return (x * scale_arr[0].astype(out_dtype)).reshape(orig_shape)

    gen = _tpu_generation()
    block_bytes, vmem_limit = _gen_block_params(gen)
    native_compute = (out_dtype == jnp.float32) or (
        out_dtype == jnp.bfloat16 and gen >= 6)

    # Minimum sublane count for this dtype: 8 (f32), 16 (bf16), 32 (int8/fp8).
    sublane = max(8, 32 // itemsize)

    flat = x.reshape(-1)                      # free for contiguous input
    aligned = (n // _LANE) * _LANE
    tail = n - aligned

    if aligned == 0:
        # Tiny ragged tensor that slipped past the fast path: pure jnp.
        return (x * scale_arr[0].astype(out_dtype)).reshape(orig_shape)

    slab = flat[:aligned].reshape(aligned // _LANE, _LANE)   # lane-dense slab
    rows = slab.shape[0]

    # Block sizing: ~block_bytes per block, sublane-granular, capped so the
    # grid keeps >= 2 steps (lets v7x megacore use both TensorCores).
    max_rows_per_block = max(sublane, block_bytes // (_LANE * itemsize))
    rows_rounded = pl.cdiv(rows, sublane) * sublane
    if rows_rounded >= 2 * sublane:
        half_rows = pl.cdiv(pl.cdiv(rows_rounded, 2), sublane) * sublane
        cap = max(sublane, half_rows)
    else:
        cap = rows_rounded
    tile_rows = min(max_rows_per_block, cap)
    tile_rows = max(sublane, (tile_rows // sublane) * sublane)

    out_slab = _scale_slab(slab, scale_arr,
                           tile_rows=tile_rows,
                           native_compute=native_compute,
                           vmem_limit=vmem_limit)

    if tail:
        # Only the <128-element tail goes through jnp; no full-tensor pad/slice.
        tail_out = flat[aligned:] * scale_arr[0].astype(out_dtype)
        return jnp.concatenate(
            [out_slab.reshape(-1), tail_out]).reshape(orig_shape)
    return out_slab.reshape(orig_shape)       # free reshape, no extra copy


if __name__ == "__main__":
    key = jax.random.PRNGKey(0)
    # NCHW input, like the PyTorch module would receive.
    x = jax.random.normal(key, (2, 4, 16, 16), dtype=jnp.float32)

    # Deterministic parameter init, matching nn.Parameter(torch.FloatTensor([0.001]))
    scale_param = jnp.array([0.001], dtype=jnp.float32)
    ref = x * scale_param[0]

    # 1) Force the Pallas path even at this small test size so the kernel
    #    itself is compiled and executed on TPU.
    y = jax.block_until_ready(scale_forward(x, scale_param, min_kernel_bytes=0))
    assert y.shape == x.shape and y.dtype == x.dtype
    assert jnp.allclose(y, ref, atol=1e-6, rtol=1e-6)

    # 2) Auto path: small tensors take the fused jnp fast path.
    y_auto = jax.block_until_ready(scale_forward(x, scale_param))
    assert y_auto.shape == x.shape and y_auto.dtype == x.dtype
    assert jnp.allclose(y_auto, ref, atol=1e-6, rtol=1e-6)

    # 3) Ragged size: kernel on the 128-aligned prefix + jnp tail (no pad/slice).
    x2 = jax.random.normal(jax.random.PRNGKey(1), (3, 5, 13), dtype=jnp.float32)
    y2 = jax.block_until_ready(scale_forward(x2, scale_param, min_kernel_bytes=0))
    assert y2.shape == x2.shape and y2.dtype == x2.dtype
    assert jnp.allclose(y2, x2 * scale_param[0], atol=1e-6, rtol=1e-6)

    print("KERNEL_OK")
</pallas_src>

<mosaic_0001>
module attributes {stable_mosaic.version = 11 : i64} {
  func.func @kernel(%arg0: i32, %arg1: memref<1xf32, #tpu.memory_space<smem>>, %arg2: memref<8x128xf32, #tpu.memory_space<vmem>>, %arg3: memref<8x128xf32, #tpu.memory_space<vmem>>) attributes {dimension_semantics = [#tpu.dimension_semantics<parallel>], iteration_bounds = array<i64: 2>, scalar_prefetch = 1 : i64, scratch_operands = 0 : i64, tpu.core_type = #tpu.core_type<tc>, window_params = [{transform_indices = @transform_0, window_bounds = array<i64: 8, 128>}, {transform_indices = @transform_1, window_bounds = array<i64: 8, 128>}]} {
    %c0 = arith.constant 0 : index
    %0 = memref.load %arg1[%c0] : memref<1xf32, #tpu.memory_space<smem>>
    %c0_0 = arith.constant 0 : index
    %c0_1 = arith.constant 0 : index
    %1 = vector.load %arg2[%c0_0, %c0_1] : memref<8x128xf32, #tpu.memory_space<vmem>>, vector<8x128xf32>
    %2 = vector.broadcast %0 : f32 to vector<8x128xf32>
    %3 = arith.mulf %1, %2 : vector<8x128xf32>
    %c0_2 = arith.constant 0 : index
    %c0_3 = arith.constant 0 : index
    %4 = vector.load %arg3[%c0_2, %c0_3] : memref<8x128xf32, #tpu.memory_space<vmem>>, vector<8x128xf32>
    tpu.vector_store %arg3[%c0_2, %c0_3], %3 {strides = array<i32>} : memref<8x128xf32, #tpu.memory_space<vmem>>, vector<8x128xf32>,
    return
  }
  func.func @transform_0(%arg0: i32, %arg1: memref<1xf32, #tpu.memory_space<smem>>) -> (i32, i32) {
    %c0_i32 = arith.constant 0 : i32
    %c0_i32_0 = arith.constant 0 : i32
    return %arg0, %c0_i32 : i32, i32
  }
  func.func @transform_1(%arg0: i32, %arg1: memref<1xf32, #tpu.memory_space<smem>>) -> (i32, i32) {
    %c0_i32 = arith.constant 0 : i32
    %c0_i32_0 = arith.constant 0 : i32
    return %arg0, %c0_i32 : i32, i32
  }
}

</mosaic_0001>

<bundles_post_ra>
// kernel: tpu_custom_call.1
= control target key start
LH: loop header
LB: loop body
LE: loop exit
PB: predicated region body
PF: predicated region fallthrough
CT: control target
= control target key end

     0   :  { %s528_s0 = inlined_call_operand.<no memory space> [shape: f32[1], index: 0, kind: input, shape index: {}]   ;;  %s529_s1 = inlined_call_operand.hbm [shape: f32[16,128], index: 1, kind: input, shape index: {}]   ;;  %s530_s2 = inlined_call_operand.hbm [shape: f32[16,128], index: 2, kind: output, shape index: {}]  }
   0x1   :  { %7 = sst [smem:[#allocation3]] %s528_s0 }
   0x2   :  { %8 = vsyncpa [#allocation5], 0 }
   0x3   :  { %10 = vsyncpa [#allocation5 + $0x1], 0 }
   0x4   :  { %11 = vsyncpa [#allocation6], 0 }
   0x5   :  { %13 = vsyncpa [#allocation6 + $0x1], 0  ;;  %s401_s11 = smov 0   ;;  %s403_s12 = smov 0  }
   0x6   :  { %s405_s13 = smov 0   ;;  %s407_s14 = smov 0  }
   0x7 LB: > { %s422_s0 = sadd.s32 4294967295, %s381_s14   ;;  %s227_s15 = sadd.s32 4294967294, %s381_s14   ;;  %s381_s14 = sphi %s407_s14, %s540_s14   ;;  %s377_s13 = sphi %s405_s13, %s539_s13   ;;  %s373_s12 = sphi %s403_s12, %s538_s12   ;;  %s369_s11 = sphi %s401_s11, %s537_s11  }
   0x8   : > { %s426_s16 = sadd.s32 1, %s381_s14   ;;  %s26_s17 = sadd.s32 1, %s377_s13 }
   0x9   : > { %s23_s18 = ssub.s32 %s381_s14, %s426_s16  ;;  %p33_p0 = scmp.ne.s32.totalorder %s377_s13, %s373_s12 }
   0xa   : > { %p24_p1 = scmp.eq.s32.totalorder %s23_s18, 0  ;;  %p34_p2 = scmp.eq.s32.totalorder %s381_s14, 0 }
   0xb   : > { %p39_p3 = scmp.ne.s32.totalorder %s373_s12, %s369_s11  ;;  %p40_p4 = scmp.eq.s32.totalorder %s422_s0, 0 }
   0xc   : > { %s438_s19 = scalar_select %p24_p1, %s377_s13, %s26_s17  }
   0xd   : > { %p440_p5 = por %p34_p2, %p33_p0  ;;  %p444_p6 = por %p40_p4, %p39_p3 }
   0xe   : > { %p63_p7 = scmp.eq.s32.totalorder %s422_s0, 1  ;;  %p69_p8 = scmp.eq.s32.totalorder %s227_s15, 1 }
   0xf   : > { %p251_p10 = scmp.lt.s32.totalorder %s381_s14, 2  ;;  %s89_s24 = sand.u32 1, %s377_s13  }
  0x10   : > { %p451_p11 = por %p63_p7, %p33_p0  ;;  %p455_p12 = por %p69_p8, %p39_p3 }
  0x11   : > { %s231_s25 = sshll.u32 %s381_s14, 3  ;;  %s230_s26 = sshll.u32 %s89_s24, 3 }
  0x12   : > { %s97_s29 = scalar_lea.hbm %s529_s1, %s231_s25  ;;  %s93_s3 = scalar_lea.vmem [#allocation4], %s230_s26 }
  0x13   : > { %s99_s30 = sshll.u32 %s97_s29, 4  ;;  %s101_s4 = sshll.u32 %s93_s3, 4  ;;  %s100_s30 = int_to_ptr.hbm [resolvable:$true] %s99_s30  ;;  %s102_s4 = int_to_ptr.vmem [resolvable:$true] %s101_s4 }
  0x14   : > { %p466_p13 = pnand %p251_p10, %p440_p5  ;;  %p232_p0 = scmp.ge.s32.totalorder %s381_s14, 1 }
  0x15   : > { %p106_p1 = scmp.lt.s32.totalorder %s381_s14, 3  ;;  %s90_s6 = scalar_lea.sflag [#allocation5], %s89_s24 }
  0x16   : > { %s285_s7 = sshra.s32 %s100_s30, 4  ;;  %p289_p3 = pneg %p466_p13  ;;  %s286_s7 = int_to_ptr.hbm [resolvable:$true] %s285_s7 }
  0x17   : > { %s287_s8 = scalar_lea.hbm %s286_s7, 8  ;;  %s292_s15 = scalar_lea.hbm %s529_s1, 16 }
  0x18   : > { %p288_p2 = scmp.ne.s32.totalorder %s286_s7, %s287_s8  ;;  %p293_p5 = scmp.lt.s32.totalorder %s286_s7, %s529_s1 }
  0x19   : > { %p294_p8 = scmp.lt.s32.totalorder %s292_s15, %s287_s8 }
  0x1a   : > { %p290_p4 = pnand %p289_p3, %p288_p2 }
  0x1b   : > { %p295_p10 = por %p294_p8, %p293_p5 }
  0x1c   : > { %p291_p7 = pneg %p290_p4 }
  0x1e   : > { %p296_p9 = pnand %p295_p10, %p291_p7 }
  0x20   : > { %299 = shalt.err (!%p296_p9)
}
  0x21   : > { %246 = dma.hbm_to_vmem [thread:$0]  (!%p466_p13), %s100_s30, 128, %s102_s4, %s90_s6  }
  0x22   : > { %p107_p2 = pnand %p232_p0, %p106_p1 }
  0x23   : > { %s487_s20 = sand.u32 (!%p107_p2), 1, %s373_s12  }
  0x24   : > { %110 = sbr.rel (%p107_p2) target bundleno = 57 (0x39), region = 24  ;;  %s233_s24 = sshll.u32 (!%p107_p2), %s487_s20, 3 }
  0x25   : > { %s113_s25 = scalar_lea.sflag (!%p107_p2), [#allocation5], %s487_s20  ;;  %s116_s26 = scalar_lea.vmem (!%p107_p2), [#allocation4], %s233_s24 }
  0x29   : > { %360 = dma.done.wait (%p444_p6), %s113_s25, 128  }
  0x2a   : > { %362 = vsyncadd (%p444_p6), %s113_s25, 4294967168  ;;  %s136_s27 = sld [smem:[#allocation3]]  ;;  %s236_s28 = sshll.u32 %s422_s0, 3  ;;  %v137_v0 = vld [vmem:[%s116_s26] sm:$0xff] }
  0x2b   : > { %s152_s3 = scalar_lea.hbm %s530_s2, %s236_s28  ;;  %s135_s4 = scalar_lea.vmem [#allocation7], %s233_s24 }
  0x2c   : > { %s154_s5 = sshll.u32 %s135_s4, 4  ;;  %s156_s6 = sshll.u32 %s152_s3, 4  ;;  %s155_s5 = int_to_ptr.vmem [resolvable:$true] %s154_s5  ;;  %s157_s6 = int_to_ptr.hbm [resolvable:$true] %s156_s6 }
  0x2d   : > { %s142_s21 = scalar_lea.sflag [#allocation6], %s487_s20  ;;  %s329_s7 = sshra.s32 %s157_s6, 4  ;;  %s330_s7 = int_to_ptr.hbm [resolvable:$true] %s329_s7 }
  0x2e   : > { %s331_s8 = scalar_lea.hbm %s330_s7, 8  ;;  %s335_s10 = scalar_lea.hbm %s530_s2, 16 }
  0x2f   : > { %p332_p6 = scmp.ne.s32.totalorder %s330_s7, %s331_s8  ;;  %p336_p0 = scmp.lt.s32.totalorder %s330_s7, %s530_s2 }
  0x30   : > { %v138_v1 = vstv %s136_s27  ;;  %p337_p1 = scmp.lt.s32.totalorder %s335_s10, %s331_s8 }
  0x31   : > { %v139_v2 = vmul.f32 %v138_v1, %v137_v0  ;;  %p333_p9 = pnand %p332_p6, %p451_p11 }
  0x32   : > { %p338_p3 = por %p337_p1, %p336_p0 }
  0x33   : > { %140 = vst [vmem:[%s135_s4] sm:$0xff] %v139_v2  ;;  %p334_p13 = pneg %p333_p9 }
  0x35   : > { %p339_p4 = pnand %p338_p3, %p334_p13 }
  0x37   : > { %342 = shalt.err (!%p339_p4)
}
  0x38   : > { %241 = dma.vmem_to_hbm [thread:$0]  (%p451_p11), %s155_s5, 128, %s157_s6, %s142_s21  }
  0x39 PF: > { %s168_s18 = sand.u32 1, %s369_s11   ;;  %p536_p7 = scmp.ge.s32.totalorder %s381_s14, 2 }
  0x3a   : > { %s169_s20 = scalar_lea.sflag [#allocation6], %s168_s18 }
  0x3b   : > { %p248_p5 = pnand %p536_p7, %p455_p12 }
  0x3d   : > { %p249_p8 = pneg %p248_p5 }
  0x3f   : > { %364 = dma.done.wait (%p249_p8), %s169_s20, 128  }
  0x40   : > { %366 = vsyncadd (%p249_p8), %s169_s20, 4294967168  ;;  %p16_p10 = scmp.ge.s32.totalorder %s426_s16, 4   ;;  %s537_s11 = smov %s373_s12 }
  0x41   : > { %s538_s12 = smov %s377_s13  ;;  %s539_s13 = smov %s438_s19 }
  0x42   : > { %s540_s14 = smov %s426_s16  ;;  %18 = sbr.rel (!%p16_p10) target bundleno = 7 (0x7), region = 69 }
  0x47   :  { %175 = vsyncpa [#allocation5], 1 }
  0x48   :  { %177 = vsyncpa [#allocation5 + $0x1], 1 }
  0x49   :  { %178 = vsyncpa [#allocation6], 1 }
  0x4a   :  { %180 = vsyncpa [#allocation6 + $0x1], 1 }

</bundles_post_ra>
